<compile_context>
chip_gen: v5e
topology: v5e:2x2
jax: 0.10.0
libtpu: 0.0.40
codegen_flags: <defaults>
</compile_context>

<pallas_src>
import jax
import jax.numpy as jnp
from jax.experimental import pallas as pl
from jax.experimental.pallas import tpu as pltpu


def _round_up(a, b):
    return (a + b - 1) // b * b


def _dupsample_matmul_kernel(x_ref, w_ref, o_ref):
    # x_ref: (M_TILE, Cinp)   flattened (N*H*W, Cin) activations, zero-padded
    # w_ref: (Cinp, Coutp)    1x1 conv weight (Cin-major), zero-padded
    # o_ref: (M_TILE, Coutp)  lane-dense output tile (Coutp % 128 == 0)
    o_ref[...] = jnp.dot(
        x_ref[...], w_ref[...], preferred_element_type=jnp.float32
    ).astype(o_ref.dtype)


def dupsampling(x_nchw, weight, *, scale, pad=0):
    """DUpsampling forward.

    x_nchw: (N, Cin, H, W)
    weight: (Cout, Cin, 1, 1) PyTorch OIHW, Cout = num_class * scale * scale
    returns (N, num_class, H*scale, W*scale)  (H, W taken after optional pad)
    """
    N, Cin, H, W = x_nchw.shape
    Cout, Cin_w, KH, KW = weight.shape
    assert (KH, KW) == (1, 1), "DUpsampling uses a 1x1 conv"
    assert Cin == Cin_w
    assert Cout % (scale * scale) == 0
    num_class = Cout // (scale * scale)

    # ---- wrapper glue (layout only) ------------------------------------
    # NCHW -> NHWC; spatial zero-pad (padding a 1x1 conv == padding its input).
    x_nhwc = jnp.transpose(x_nchw, (0, 2, 3, 1))
    if pad:
        x_nhwc = jnp.pad(x_nhwc, ((0, 0), (pad, pad), (pad, pad), (0, 0)))
    Hc, Wc = x_nhwc.shape[1], x_nhwc.shape[2]

    # Collapse batch + spatial into the matmul M dimension.
    M = N * Hc * Wc
    x_flat = x_nhwc.reshape(M, Cin)

    # Lane-dense / sublane-aligned padding.
    Cinp = _round_up(Cin, 8)
    Coutp = _round_up(Cout, 128)

    # M tile: sublane-aligned; >= 2 parallel grid steps when M allows so both
    # v7x TensorCores are used; big enough to amortize per-step overhead.
    if M >= 1024:
        m_tile = 512
    elif M >= 512:
        m_tile = 256
    elif M >= 16:
        m_tile = _round_up(M // 2, 8)
    else:
        m_tile = _round_up(max(M, 1), 8)
    Mp = _round_up(M, m_tile)

    x_flat = jnp.pad(x_flat, ((0, Mp - M), (0, Cinp - Cin))).astype(jnp.float32)

    # (Cout, Cin, 1, 1) -> (Cin, Cout), zero-padded to (Cinp, Coutp).
    w2d = jnp.transpose(weight.reshape(Cout, Cin), (1, 0))
    w2d = jnp.pad(w2d, ((0, Cinp - Cin), (0, Coutp - Cout))).astype(jnp.float32)

    grid = (Mp // m_tile,)
    y_flat = pl.pallas_call(
        _dupsample_matmul_kernel,
        out_shape=jax.ShapeDtypeStruct((Mp, Coutp), jnp.float32),
        grid=grid,
        in_specs=[
            pl.BlockSpec((m_tile, Cinp), lambda i: (i, 0)),
            pl.BlockSpec((Cinp, Coutp), lambda i: (0, 0)),
        ],
        out_specs=pl.BlockSpec((m_tile, Coutp), lambda i: (i, 0)),
        compiler_params=pltpu.CompilerParams(
            dimension_semantics=("parallel",)),
    )(x_flat, w2d)

    # ---- DUpsampling permutation (pure layout, matches PyTorch exactly) --
    # y_flat[m, c] with m = n*Hc*Wc + h*Wc + w and
    #   c = (s1*scale + s2) * num_class + c2
    # maps to out[n, c2, h*scale + s2, w*scale + s1].
    y = y_flat[:M, :Cout].reshape(N, Hc, Wc, scale, scale, num_class)
    out = jnp.transpose(y, (0, 5, 1, 4, 2, 3))
    return out.reshape(N, num_class, Hc * scale, Wc * scale)


def _reference(x_nchw, weight, *, scale, pad=0):
    """Direct JAX transliteration of the PyTorch DUpsampling forward."""
    y = jax.lax.conv_general_dilated(
        x_nchw, weight, window_strides=(1, 1),
        padding=[(pad, pad), (pad, pad)],
        dimension_numbers=("NCHW", "OIHW", "NCHW"))
    N, C, H, W = y.shape
    yp = jnp.transpose(y, (0, 2, 3, 1))
    yp = yp.reshape(N, H, W * scale, C // scale)
    yp = jnp.transpose(yp, (0, 2, 1, 3))
    yp = yp.reshape(N, W * scale, H * scale, C // (scale * scale))
    return jnp.transpose(yp, (0, 3, 2, 1))


if __name__ == "__main__":
    key = jax.random.PRNGKey(0)
    k1, k2 = jax.random.split(key)

    # Module config: inplanes=4, scale=2, num_class=8 -> Cout = 32.
    N, inplanes, H, W = 2, 4, 16, 16
    scale, num_class, pad = 2, 8, 0
    Cout = num_class * scale * scale

    x = jax.random.normal(k1, (N, inplanes, H, W), dtype=jnp.float32)
    weight = jax.random.normal(k2, (Cout, inplanes, 1, 1), dtype=jnp.float32) * 0.1

    out = dupsampling(x, weight, scale=scale, pad=pad)
    out = jax.block_until_ready(out)

    ref = _reference(x, weight, scale=scale, pad=pad)
    assert out.shape == (N, num_class, H * scale, W * scale)
    assert jnp.allclose(out, ref, atol=1e-4, rtol=1e-4), "mismatch vs reference"

    print("KERNEL_OK")
</pallas_src>

<mosaic_0001>
module attributes {stable_mosaic.version = 11 : i64} {
  func.func @_dupsample_matmul_kernel(%arg0: i32, %arg1: memref<256x8xf32, #tpu.memory_space<vmem>>, %arg2: memref<8x128xf32, #tpu.memory_space<vmem>>, %arg3: memref<256x128xf32, #tpu.memory_space<vmem>>) attributes {dimension_semantics = [#tpu.dimension_semantics<parallel>], iteration_bounds = array<i64: 2>, scalar_prefetch = 0 : i64, scratch_operands = 0 : i64, tpu.core_type = #tpu.core_type<tc>, window_params = [{transform_indices = @transform_0, window_bounds = array<i64: 256, 8>}, {pipeline_mode = #tpu.pipeline_mode<synchronous>, transform_indices = @transform_1, window_bounds = array<i64: 8, 128>}, {transform_indices = @transform_2, window_bounds = array<i64: 256, 128>}]} {
    %c0 = arith.constant 0 : index
    %c0_0 = arith.constant 0 : index
    %0 = vector.load %arg1[%c0, %c0_0] : memref<256x8xf32, #tpu.memory_space<vmem>>, vector<256x8xf32>
    %c0_1 = arith.constant 0 : index
    %c0_2 = arith.constant 0 : index
    %1 = vector.load %arg2[%c0_1, %c0_2] : memref<8x128xf32, #tpu.memory_space<vmem>>, vector<8x128xf32>
    %cst = arith.constant dense<0.000000e+00> : vector<256x128xf32>
    %2 = tpu.matmul %0, %1, %cst {dimension_numbers = #tpu.dot_dimension_numbers<[1], [0], [0], [1], [0, 0, 1, 1], [], []>} : vector<256x8xf32>, vector<8x128xf32>, vector<256x128xf32> -> vector<256x128xf32>
    %c0_3 = arith.constant 0 : index
    %c0_4 = arith.constant 0 : index
    %3 = vector.load %arg3[%c0_3, %c0_4] : memref<256x128xf32, #tpu.memory_space<vmem>>, vector<256x128xf32>
    tpu.vector_store %arg3[%c0_3, %c0_4], %2 {strides = array<i32>} : memref<256x128xf32, #tpu.memory_space<vmem>>, vector<256x128xf32>,
    return
  }
  func.func @transform_0(%arg0: i32) -> (i32, i32) {
    %c0_i32 = arith.constant 0 : i32
    %c0_i32_0 = arith.constant 0 : i32
    return %arg0, %c0_i32 : i32, i32
  }
  func.func @transform_1(%arg0: i32) -> (i32, i32) {
    %c0_i32 = arith.constant 0 : i32
    %c0_i32_0 = arith.constant 0 : i32
    %c0_i32_1 = arith.constant 0 : i32
    return %c0_i32, %c0_i32_0 : i32, i32
  }
  func.func @transform_2(%arg0: i32) -> (i32, i32) {
    %c0_i32 = arith.constant 0 : i32
    %c0_i32_0 = arith.constant 0 : i32
    return %arg0, %c0_i32 : i32, i32
  }
}

</mosaic_0001>

<bundles_post_ra>
// kernel: tpu_custom_call.1
= control target key start
LH: loop header
LB: loop body
LE: loop exit
PB: predicated region body
PF: predicated region fallthrough
CT: control target
= control target key end

     0   :  { %7 = vsyncpa [#allocation3], 0  ;;  %s860_s0 = inlined_call_operand.vmem [shape: f32[512,8], index: 0, kind: input, shape index: {}]   ;;  %s861_s1 = inlined_call_operand.vmem [shape: f32[8,128], index: 1, kind: input, shape index: {}]   ;;  %s862_s2 = inlined_call_operand.hbm [shape: f32[512,128], index: 2, kind: output, shape index: {}]  }
   0x1   :  { %9 = vsyncpa [#allocation3 + $0x1], 0  ;;  %s668_s9 = smov 0   ;;  %s670_s10 = smov 0  }
   0x2   :  { %s672_s11 = smov 0   ;;  %s674_s12 = smov 0  }
   0x3 LB: > { %s689_s13 = sadd.s32 4294967295, %s649_s12   ;;  %s498_s14 = sadd.s32 4294967294, %s649_s12   ;;  %s649_s12 = sphi %s674_s12, %s868_s12   ;;  %s645_s11 = sphi %s672_s11, %s867_s11   ;;  %s641_s10 = sphi %s670_s10, %s866_s10   ;;  %s637_s9 = sphi %s668_s9, %s865_s9  }
   0x4   : > { %s693_s15 = sadd.s32 1, %s649_s12   ;;  %s69_s16 = sadd.s32 1, %s645_s11 }
   0x5   : > { %s66_s17 = ssub.s32 %s649_s12, %s693_s15  ;;  %p79_p0 = scmp.ne.s32.totalorder %s645_s11, %s641_s10 }
   0x6   : > { %p67_p1 = scmp.eq.s32.totalorder %s66_s17, 0  ;;  %p80_p2 = scmp.eq.s32.totalorder %s689_s13, 1 }
   0x7   : > { %p85_p3 = scmp.ne.s32.totalorder %s641_s10, %s637_s9  ;;  %p86_p4 = scmp.eq.s32.totalorder %s498_s14, 1 }
   0x8   : > { %s704_s18 = scalar_select %p67_p1, %s645_s11, %s69_s16  }
   0x9   : > { %p706_p5 = por %p80_p2, %p79_p0  ;;  %p710_p6 = por %p86_p4, %p85_p3 }
   0xa   : > { %p501_p7 = scmp.ge.s32.totalorder %s649_s12, 1  ;;  %p116_p8 = scmp.lt.s32.totalorder %s649_s12, 3 }
   0xc   : > { %p117_p9 = pnand %p501_p7, %p116_p8 }
   0xd   : > { %s503_s23 = sshll.u32 (!%p117_p9), %s689_s13, 5  ;;  %s135_s28 = sand.u32 (!%p117_p9), 1, %s641_s10  }
   0xe   : > { %120 = sbr.rel (%p117_p9) target bundleno = 216 (0xd8), region = 28  ;;  %p139_p10 = scmp.lt.s32.totalorder (!%p117_p9), %s503_s23, 63 }
   0xf   : > { %s502_s29 = sshll.u32 (!%p117_p9), %s135_s28, 8  ;;  %s542_s3 = sshll.u32 (!%p117_p9), %s689_s13, 8 }
  0x10   : > { %s792_s30 = scalar_lea.vmem (!%p117_p9), [#allocation2], %s502_s29  ;;  %s432_s6 = scalar_lea.hbm (!%p117_p9), %s862_s2, %s542_s3 }
  0x11   : > { %s433_s7 = sshll.u32 (!%p117_p9), %s792_s30, 4  ;;  %s435_s8 = sshll.u32 (!%p117_p9), %s432_s6, 4  ;;  %s434_s7 = int_to_ptr.vmem [resolvable:$true] %s433_s7  ;;  %s436_s8 = int_to_ptr.hbm [resolvable:$true] %s435_s8 }
  0x12   : > { %s421_s13 = scalar_lea.sflag (!%p117_p9), [#allocation3], %s135_s28  ;;  %s601_s14 = sshra.s32 (!%p117_p9), %s436_s8, 4  ;;  %s602_s14 = int_to_ptr.hbm [resolvable:$true] %s601_s14 }
  0x13   : > { %v177_v0 = vld [vmem:[%s861_s1] sm:$0xff]  ;;  %s870_s23 = smov (!%p139_p10, %s503_s23), 63  ;;  %vm178_vm0 = vcmask 64512   ;;  %s603_s16 = scalar_lea.hbm %s602_s14, 256 }
  0x14   : > { %544 = vmatpush.msra.mxu2 %v177_v0  ;;  %545 = vmatpush.msra.mxu3 %v177_v0  ;;  %s504_s24 = sshll.u32 %s870_s23, 3  ;;  %p604_p11 = scmp.ne.s32.totalorder %s602_s14, %s603_s16 }
  0x15   : > { %290 = vmatpush.msra.mxu0 %v177_v0  ;;  %543 = vmatpush.msra.mxu1 %v177_v0  ;;  %s723_s27 = scalar_lea.vmem %s860_s0, %s504_s24  ;;  %s607_s22 = scalar_lea.hbm %s862_s2, 512 }
  0x16   : > { %v161_v1 = vld [vmem:[%s723_s27 + $0x80] sm:$0xff]  ;;  %v162_v5 = vld [vmem:[%s723_s27 + $0x88] sm:$0xff]  ;;  %v163_v9 = vld [vmem:[%s723_s27 + $0x90] sm:$0xff]  ;;  %p605_p12 = pnand %p604_p11, %p706_p5  ;;  %p608_p0 = scmp.lt.s32.totalorder %s602_s14, %s862_s2 }
  0x17   : > { %v169_v2 = vld [vmem:[%s723_s27 + $0xc0] sm:$0xff]  ;;  %521 = vmatmul.msk.f32.vlgmr.msra.gmra.mxu2 %vm178_vm0, %v161_v1  ;;  %v170_v6 = vld [vmem:[%s723_s27 + $0xc8] sm:$0xff]  ;;  %v171_v10 = vld [vmem:[%s723_s27 + $0xd0] sm:$0xff]  ;;  %p609_p1 = scmp.lt.s32.totalorder %s607_s22, %s603_s16 }
  0x18   : > { %v145_v3 = vld [vmem:[%s723_s27] sm:$0xff]  ;;  %529 = vmatmul.msk.f32.vlgmr.msra.gmra.mxu3 %vm178_vm0, %v169_v2  ;;  %v146_v7 = vld [vmem:[%s723_s27 + $0x8] sm:$0xff]  ;;  %v147_v11 = vld [vmem:[%s723_s27 + $0x10] sm:$0xff]  ;;  %p606_p13 = pneg %p605_p12 }
  0x19   : > { %v153_v4 = vld [vmem:[%s723_s27 + $0x40] sm:$0xff]  ;;  %505 = vmatmul.msk.f32.vlgmr.msra.gmra.mxu0 %vm178_vm0, %v145_v3  ;;  %v154_v8 = vld [vmem:[%s723_s27 + $0x48] sm:$0xff]  ;;  %v155_v12 = vld [vmem:[%s723_s27 + $0x50] sm:$0xff]  ;;  %p610_p2 = por %p609_p1, %p608_p0 }
  0x1a   : > { %513 = vmatmul.msk.f32.vlgmr.msra.gmra.mxu1 %vm178_vm0, %v153_v4  ;;  %v164_v13 = vld [vmem:[%s723_s27 + $0x98] sm:$0xff]  ;;  %v165_v17 = vld [vmem:[%s723_s27 + $0xa0] sm:$0xff]  ;;  %v166_v21 = vld [vmem:[%s723_s27 + $0xa8] sm:$0xff] }
  0x1b   : > { %v172_v14 = vld [vmem:[%s723_s27 + $0xd8] sm:$0xff]  ;;  %v173_v18 = vld [vmem:[%s723_s27 + $0xe0] sm:$0xff]  ;;  %v174_v22 = vld [vmem:[%s723_s27 + $0xe8] sm:$0xff]  ;;  %p611_p3 = pnand %p610_p2, %p606_p13 }
  0x1c   : > { %v148_v15 = vld [vmem:[%s723_s27 + $0x18] sm:$0xff]  ;;  %v149_v19 = vld [vmem:[%s723_s27 + $0x20] sm:$0xff]  ;;  %v150_v23 = vld [vmem:[%s723_s27 + $0x28] sm:$0xff] }
  0x1d   : > { %v156_v16 = vld [vmem:[%s723_s27 + $0x58] sm:$0xff]  ;;  %v157_v20 = vld [vmem:[%s723_s27 + $0x60] sm:$0xff]  ;;  %v158_v24 = vld [vmem:[%s723_s27 + $0x68] sm:$0xff] }
  0x1e   : > { %v167_v25 = vld [vmem:[%s723_s27 + $0xb0] sm:$0xff]  ;;  %v168_v29 = vld [vmem:[%s723_s27 + $0xb8] sm:$0xff] }
  0x1f   : > { %522 = vmatmul.msk.f32.gmra.mxu2 %vm178_vm0, %v162_v5  ;;  %v175_v26 = vld [vmem:[%s723_s27 + $0xf0] sm:$0xff]  ;;  %v176_v30 = vld [vmem:[%s723_s27 + $0xf8] sm:$0xff] }
  0x20   : > { %530 = vmatmul.msk.f32.gmra.mxu3 %vm178_vm0, %v170_v6  ;;  %v151_v27 = vld [vmem:[%s723_s27 + $0x30] sm:$0xff]  ;;  %v152_v31 = vld [vmem:[%s723_s27 + $0x38] sm:$0xff] }
  0x21   : > { %506 = vmatmul.msk.f32.gmra.mxu0 %vm178_vm0, %v146_v7  ;;  %v159_v28 = vld [vmem:[%s723_s27 + $0x70] sm:$0xff]  ;;  %v160_v32 = vld [vmem:[%s723_s27 + $0x78] sm:$0xff] }
  0x22   : > { %514 = vmatmul.msk.f32.gmra.mxu1 %vm178_vm0, %v154_v8 }
  0x27   : > { %523 = vmatmul.msk.f32.gmra.mxu2 %vm178_vm0, %v163_v9 }
  0x28   : > { %531 = vmatmul.msk.f32.gmra.mxu3 %vm178_vm0, %v171_v10 }
  0x29   : > { %507 = vmatmul.msk.f32.gmra.mxu0 %vm178_vm0, %v147_v11 }
  0x2a   : > { %515 = vmatmul.msk.f32.gmra.mxu1 %vm178_vm0, %v155_v12 }
  0x2f   : > { %524 = vmatmul.msk.f32.gmra.mxu2 %vm178_vm0, %v164_v13 }
  0x30   : > { %532 = vmatmul.msk.f32.gmra.mxu3 %vm178_vm0, %v172_v14 }
  0x31   : > { %508 = vmatmul.msk.f32.gmra.mxu0 %vm178_vm0, %v148_v15 }
  0x32   : > { %516 = vmatmul.msk.f32.gmra.mxu1 %vm178_vm0, %v156_v16 }
  0x37   : > { %525 = vmatmul.msk.f32.gmra.mxu2 %vm178_vm0, %v165_v17 }
  0x38   : > { %533 = vmatmul.msk.f32.gmra.mxu3 %vm178_vm0, %v173_v18 }
  0x39   : > { %509 = vmatmul.msk.f32.gmra.mxu0 %vm178_vm0, %v149_v19 }
  0x3a   : > { %517 = vmatmul.msk.f32.gmra.mxu1 %vm178_vm0, %v157_v20 }
  0x3f   : > { %526 = vmatmul.msk.f32.gmra.mxu2 %vm178_vm0, %v166_v21 }
  0x40   : > { %534 = vmatmul.msk.f32.gmra.mxu3 %vm178_vm0, %v174_v22 }
  0x41   : > { %510 = vmatmul.msk.f32.gmra.mxu0 %vm178_vm0, %v150_v23 }
  0x42   : > { %518 = vmatmul.msk.f32.gmra.mxu1 %vm178_vm0, %v158_v24 }
  0x47   : > { %527 = vmatmul.msk.f32.gmra.mxu2 %vm178_vm0, %v167_v25 }
  0x48   : > { %535 = vmatmul.msk.f32.gmra.mxu3 %vm178_vm0, %v175_v26 }
  0x49   : > { %511 = vmatmul.msk.f32.gmra.mxu0 %vm178_vm0, %v151_v27 }
  0x4a   : > { %519 = vmatmul.msk.f32.gmra.mxu1 %vm178_vm0, %v159_v28 }
  0x4f   : > { %528 = vmatmul.msk.f32.gmra.mxu2 %vm178_vm0, %v168_v29 }
  0x50   : > { %536 = vmatmul.msk.f32.gmra.mxu3 %vm178_vm0, %v176_v30 }
  0x51   : > { %512 = vmatmul.msk.f32.gmra.mxu0 %vm178_vm0, %v152_v31 }
  0x52   : > { %520 = vmatmul.msk.f32.gmra.mxu1 %vm178_vm0, %v160_v32 }
  0x96   : > { %v292_v33 = vpop.f32.mrf.mxu0 }
  0x97   : > { %v316_v34 = vpop.f32.mrf.mxu1  ;;  %388 = vst [vmem:[%s792_s30] sm:$0xff] %v292_v33 }
  0x98   : > { %396 = vst [vmem:[%s792_s30 + $0x40] sm:$0xff] %v316_v34 }
  0x9a   : > { %v340_v35 = vpop.f32.mrf.mxu2 }
  0x9b   : > { %v364_v36 = vpop.f32.mrf.mxu3  ;;  %404 = vst [vmem:[%s792_s30 + $0x80] sm:$0xff] %v340_v35 }
  0x9c   : > { %412 = vst [vmem:[%s792_s30 + $0xc0] sm:$0xff] %v364_v36 }
  0x9e   : > { %v295_v37 = vpop.f32.mrf.mxu0 }
  0x9f   : > { %v319_v38 = vpop.f32.mrf.mxu1  ;;  %389 = vst [vmem:[%s792_s30 + $0x8] sm:$0xff] %v295_v37 }
  0xa0   : > { %397 = vst [vmem:[%s792_s30 + $0x48] sm:$0xff] %v319_v38 }
  0xa2   : > { %v343_v39 = vpop.f32.mrf.mxu2 }
  0xa3   : > { %v367_v40 = vpop.f32.mrf.mxu3  ;;  %405 = vst [vmem:[%s792_s30 + $0x88] sm:$0xff] %v343_v39 }
  0xa4   : > { %413 = vst [vmem:[%s792_s30 + $0xc8] sm:$0xff] %v367_v40 }
  0xa6   : > { %v298_v41 = vpop.f32.mrf.mxu0 }
  0xa7   : > { %v322_v42 = vpop.f32.mrf.mxu1  ;;  %390 = vst [vmem:[%s792_s30 + $0x10] sm:$0xff] %v298_v41 }
  0xa8   : > { %398 = vst [vmem:[%s792_s30 + $0x50] sm:$0xff] %v322_v42 }
  0xaa   : > { %v346_v43 = vpop.f32.mrf.mxu2 }
  0xab   : > { %v370_v44 = vpop.f32.mrf.mxu3  ;;  %406 = vst [vmem:[%s792_s30 + $0x90] sm:$0xff] %v346_v43 }
  0xac   : > { %414 = vst [vmem:[%s792_s30 + $0xd0] sm:$0xff] %v370_v44 }
  0xae   : > { %v301_v45 = vpop.f32.mrf.mxu0 }
  0xaf   : > { %v325_v46 = vpop.f32.mrf.mxu1  ;;  %391 = vst [vmem:[%s792_s30 + $0x18] sm:$0xff] %v301_v45 }
  0xb0   : > { %399 = vst [vmem:[%s792_s30 + $0x58] sm:$0xff] %v325_v46 }
  0xb2   : > { %v349_v47 = vpop.f32.mrf.mxu2 }
  0xb3   : > { %v373_v48 = vpop.f32.mrf.mxu3  ;;  %407 = vst [vmem:[%s792_s30 + $0x98] sm:$0xff] %v349_v47 }
  0xb4   : > { %415 = vst [vmem:[%s792_s30 + $0xd8] sm:$0xff] %v373_v48 }
  0xb6   : > { %v304_v49 = vpop.f32.mrf.mxu0 }
  0xb7   : > { %v328_v50 = vpop.f32.mrf.mxu1  ;;  %392 = vst [vmem:[%s792_s30 + $0x20] sm:$0xff] %v304_v49 }
  0xb8   : > { %400 = vst [vmem:[%s792_s30 + $0x60] sm:$0xff] %v328_v50 }
  0xba   : > { %v352_v51 = vpop.f32.mrf.mxu2 }
  0xbb   : > { %v376_v52 = vpop.f32.mrf.mxu3  ;;  %408 = vst [vmem:[%s792_s30 + $0xa0] sm:$0xff] %v352_v51 }
  0xbc   : > { %416 = vst [vmem:[%s792_s30 + $0xe0] sm:$0xff] %v376_v52 }
  0xbe   : > { %v307_v53 = vpop.f32.mrf.mxu0 }
  0xbf   : > { %v331_v54 = vpop.f32.mrf.mxu1  ;;  %393 = vst [vmem:[%s792_s30 + $0x28] sm:$0xff] %v307_v53 }
  0xc0   : > { %401 = vst [vmem:[%s792_s30 + $0x68] sm:$0xff] %v331_v54 }
  0xc2   : > { %v355_v55 = vpop.f32.mrf.mxu2 }
  0xc3   : > { %v379_v56 = vpop.f32.mrf.mxu3  ;;  %409 = vst [vmem:[%s792_s30 + $0xa8] sm:$0xff] %v355_v55 }
  0xc4   : > { %417 = vst [vmem:[%s792_s30 + $0xe8] sm:$0xff] %v379_v56 }
  0xc6   : > { %v310_v57 = vpop.f32.mrf.mxu0 }
  0xc7   : > { %v334_v58 = vpop.f32.mrf.mxu1  ;;  %394 = vst [vmem:[%s792_s30 + $0x30] sm:$0xff] %v310_v57 }
  0xc8   : > { %402 = vst [vmem:[%s792_s30 + $0x70] sm:$0xff] %v334_v58 }
  0xca   : > { %v358_v59 = vpop.f32.mrf.mxu2 }
  0xcb   : > { %v382_v60 = vpop.f32.mrf.mxu3  ;;  %410 = vst [vmem:[%s792_s30 + $0xb0] sm:$0xff] %v358_v59 }
  0xcc   : > { %418 = vst [vmem:[%s792_s30 + $0xf0] sm:$0xff] %v382_v60 }
  0xce   : > { %v313_v61 = vpop.f32.mrf.mxu0 }
  0xcf   : > { %v337_v62 = vpop.f32.mrf.mxu1  ;;  %395 = vst [vmem:[%s792_s30 + $0x38] sm:$0xff] %v313_v61 }
  0xd0   : > { %403 = vst [vmem:[%s792_s30 + $0x78] sm:$0xff] %v337_v62 }
  0xd2   : > { %v361_v63 = vpop.f32.mrf.mxu2 }
  0xd3   : > { %v385_v0 = vpop.f32.mrf.mxu3  ;;  %411 = vst [vmem:[%s792_s30 + $0xb8] sm:$0xff] %v361_v63 }
  0xd4   : > { %419 = vst [vmem:[%s792_s30 + $0xf8] sm:$0xff] %v385_v0 }
  0xd5   : > { %614 = shalt.err (!%p611_p3)
}
  0xd6   : > { %s651_s25 = smov 128   ;;  %s652_s26 = smov 8  }
  0xd7   : > { %546 = dma.vmem_to_hbm [thread:$0]  (%p706_p5), %s434_s7, 4096, %s436_s8, %s421_s13, %s651_s25, %s651_s25, %s652_s26  }
  0xd8 PF: > { %p552_p4 = scmp.ge.s32.totalorder %s649_s12, 2  ;;  %s450_s27 = sand.u32 1, %s637_s9  }
  0xd9   : > { %s451_s28 = scalar_lea.sflag [#allocation3], %s450_s27 }
  0xda   : > { %p549_p7 = pnand %p552_p4, %p710_p6 }
  0xdc   : > { %p550_p8 = pneg %p549_p7 }
  0xde   : > { %632 = dma.done.wait (%p550_p8), %s451_s28, 4096  }
  0xdf   : > { %634 = vsyncadd (%p550_p8), %s451_s28, 4294963200  ;;  %p12_p9 = scmp.ge.s32.totalorder %s693_s15, 4   ;;  %s865_s9 = smov %s641_s10 }
  0xe0   : > { %s866_s10 = smov %s645_s11  ;;  %s867_s11 = smov %s704_s18 }
  0xe1   : > { %s868_s12 = smov %s693_s15  ;;  %14 = sbr.rel (!%p12_p9) target bundleno = 3 (0x3), region = 63 }
  0xe6   :  { %457 = vsyncpa [#allocation3], 1 }
  0xe7   :  { %459 = vsyncpa [#allocation3 + $0x1], 1 }

</bundles_post_ra>
